<compile_context>
chip_gen: v5e
topology: v5e:2x2
jax: 0.10.0
libtpu: 0.0.40
codegen_flags: <defaults>
</compile_context>

<pallas_src>
import functools

import numpy as np
import jax
import jax.numpy as jnp
from jax.experimental import pallas as pl
from jax.experimental.pallas import tpu as pltpu


# ---------------------------------------------------------------------------
# Kernels
# ---------------------------------------------------------------------------

def _sa_kernel_matmul(x_ref, wmat_ref, b_ref, o_ref, *, C):
    """MXU path: conv(7x7, pad=3) baked into a dense (2*HW, HW) matrix."""
    # x_ref: (Bt, C, HW) VMEM block (lane-dense last dim)
    # wmat_ref: (2*HW, HW) VMEM  -- rows [0, HW) weight the max map,
    #                               rows [HW, 2*HW) weight the mean map
    # b_ref: (1,) SMEM -- conv bias
    xn = x_ref[...]                                        # native dtype, short-lived
    mx = jnp.max(xn, axis=1).astype(jnp.float32)           # (Bt, HW)  channel max
    av = jnp.sum(xn.astype(jnp.float32), axis=1) * (1.0 / C)   # (Bt, HW) channel mean

    feat = jnp.concatenate([mx, av], axis=-1)              # (Bt, 2*HW), order = [max, avg]
    logits = jnp.dot(feat, wmat_ref[...],
                     preferred_element_type=jnp.float32) + b_ref[0]
    attn = jax.nn.sigmoid(logits)                          # (Bt, HW)

    # Re-read x for the final multiply instead of keeping an f32 copy live.
    o_ref[...] = (x_ref[...].astype(jnp.float32) * attn[:, None, :]).astype(o_ref.dtype)


def _sa_kernel_taps(x_ref, w_ref, b_ref, o_ref, *, H, W, C, HW):
    """VPU fallback for large HW: 49-tap shift-and-mask conv in the flat domain."""
    # x_ref: (Bt, C, HW); w_ref: (98,) SMEM (w[0:49]=max-map taps, w[49:98]=mean-map taps)
    xn = x_ref[...]
    mx = jnp.max(xn, axis=1).astype(jnp.float32)           # (Bt, HW)
    av = jnp.sum(xn.astype(jnp.float32), axis=1) * (1.0 / C)

    # Doubled maps: static lane slice [s : s + HW] of [map, map] == flat shift by s.
    mxd = jnp.concatenate([mx, mx], axis=-1)               # (Bt, 2*HW)
    avd = jnp.concatenate([av, av], axis=-1)

    # Validity masks (hoisted out of the tap loop).
    idx = jax.lax.broadcasted_iota(jnp.int32, (1, HW), 1)
    row = idx // W
    col = idx - row * W
    rmask = [(row + (kh - 3) >= 0) & (row + (kh - 3) < H) for kh in range(7)]
    cmask = [(col + (kw - 3) >= 0) & (col + (kw - 3) < W) for kw in range(7)]

    bt = mx.shape[0]
    acc = jnp.full((bt, HW), b_ref[0], dtype=jnp.float32)
    for kh in range(7):
        for kw in range(7):
            d = (kh - 3) * W + (kw - 3)
            s = d % HW
            term = (w_ref[kh * 7 + kw] * mxd[:, s:s + HW]
                    + w_ref[49 + kh * 7 + kw] * avd[:, s:s + HW])
            acc = acc + jnp.where(rmask[kh] & cmask[kw], term, 0.0)

    attn = jax.nn.sigmoid(acc)
    o_ref[...] = (x_ref[...].astype(jnp.float32) * attn[:, None, :]).astype(o_ref.dtype)


# ---------------------------------------------------------------------------
# Host-side helpers
# ---------------------------------------------------------------------------

def _vmem_capacity_bytes():
    """Physical VMEM of the local chip; conservative (v7x) fallback."""
    try:
        return int(pltpu.get_tpu_info().vmem_capacity_bytes)
    except Exception:
        return 64 * 1024 * 1024


def _pick_block_batch(B, C, HW, itemsize, budget_bytes):
    """Largest bt whose (bt, C, HW) block fits the budget, with >= 2 grid steps."""
    per_image = max(C * HW * itemsize, 1)
    cap = max(1, budget_bytes // per_image)
    if B >= 2:
        # Guarantee grid >= 2 so both v7x TensorCores get work.
        cap = min(cap, (B + 1) // 2)
    return max(1, min(cap, B))


def _build_conv_matrix(conv_w, H, W):
    """Bake the 7x7/pad-3 conv (shifts + boundary masks + weights) into (2*HW, HW).

    Column p_out = r*W + s receives, at row c*HW + p_in, the weight
    conv_w[0, c, kh, kw] where p_in = (r+kh-3)*W + (s+kw-3) is in bounds.
    Channel 0 = max map, channel 1 = mean map (matches torch.cat([max, avg], 1)).
    """
    HW = H * W
    rows, cols, taps = [], [], []
    for kh in range(7):
        for kw in range(7):
            t = kh * 7 + kw
            for r in range(H):
                ri = r + kh - 3
                if ri < 0 or ri >= H:
                    continue
                for s in range(W):
                    si = s + kw - 3
                    if si < 0 or si >= W:
                        continue
                    rows.append(ri * W + si)
                    cols.append(r * W + s)
                    taps.append(t)
    rows = np.asarray(rows, np.int32)
    cols = np.asarray(cols, np.int32)
    taps = np.asarray(taps, np.int32)

    w2 = conv_w.reshape(2, 49).astype(jnp.float32)          # (2, 49)
    wmat = jnp.zeros((2, HW, HW), jnp.float32)
    wmat = wmat.at[:, rows, cols].set(w2[:, taps])           # no index collisions
    return wmat.reshape(2 * HW, HW)


# ---------------------------------------------------------------------------
# Public wrapper
# ---------------------------------------------------------------------------

def spatial_attention(x, conv_w, conv_b):
    """x: (B, C, H, W); conv_w: (1, 2, 7, 7); conv_b: (1,)."""
    B, C, H, W = x.shape
    HW = H * W
    xf = x.reshape(B, C, HW)                                 # lane-dense layout

    vmem_cap = _vmem_capacity_bytes()
    # ~96 MiB scoped limit on 128 MiB chips (v5e/v6e), ~48 MiB on 64 MiB v7x.
    vmem_limit = max(min(vmem_cap * 3 // 4, 96 * 1024 * 1024), 32 * 1024 * 1024)
    # 2x-buffered input + 2x-buffered output + f32 intermediates + headroom.
    block_budget = vmem_limit // 8

    bt = _pick_block_batch(B, C, HW, x.dtype.itemsize, block_budget)
    grid = pl.cdiv(B, bt)

    b_smem = conv_b.reshape(-1).astype(jnp.float32)
    # MXU path only while the baked weight matrix stays small (O(HW^2) memory).
    use_matmul = (2 * HW * HW * 4) <= (4 * 1024 * 1024)

    if use_matmul:
        wmat = _build_conv_matrix(conv_w, H, W)
        kernel = functools.partial(_sa_kernel_matmul, C=C)
        in_specs = [
            pl.BlockSpec((bt, C, HW), lambda b: (b, 0, 0)),
            pl.BlockSpec((2 * HW, HW), lambda b: (0, 0)),
            pl.BlockSpec(memory_space=pltpu.MemorySpace.SMEM),
        ]
        args = (xf, wmat, b_smem)
    else:
        kernel = functools.partial(_sa_kernel_taps, H=H, W=W, C=C, HW=HW)
        in_specs = [
            pl.BlockSpec((bt, C, HW), lambda b: (b, 0, 0)),
            pl.BlockSpec(memory_space=pltpu.MemorySpace.SMEM),
            pl.BlockSpec(memory_space=pltpu.MemorySpace.SMEM),
        ]
        args = (xf, conv_w.reshape(-1).astype(jnp.float32), b_smem)

    out = pl.pallas_call(
        kernel,
        out_shape=jax.ShapeDtypeStruct((B, C, HW), x.dtype),
        grid_spec=pltpu.PrefetchScalarGridSpec(
            num_scalar_prefetch=0,
            grid=(grid,),
            in_specs=in_specs,
            out_specs=pl.BlockSpec((bt, C, HW), lambda b: (b, 0, 0)),
        ),
        compiler_params=pltpu.CompilerParams(
            dimension_semantics=("parallel",),               # batch steps across TCs (v7x)
            vmem_limit_bytes=vmem_limit,
        ),
    )(*args)
    return out.reshape(B, C, H, W)


def spatial_attention_ref(x, conv_w, conv_b):
    """Pure-JAX reference matching the PyTorch forward."""
    mx = jnp.max(x, axis=1, keepdims=True)
    av = jnp.mean(x, axis=1, keepdims=True)
    r = jnp.concatenate([mx, av], axis=1)                    # [max, avg] — matches torch.cat
    out = jax.lax.conv_general_dilated(
        r, conv_w, window_strides=(1, 1), padding=[(3, 3), (3, 3)],
        dimension_numbers=("NCHW", "OIHW", "NCHW"),
    ) + conv_b.reshape(1, 1, 1, 1)
    return x * jax.nn.sigmoid(out)


if __name__ == "__main__":
    key = jax.random.PRNGKey(0)
    kx, kw = jax.random.split(key)

    B, C, H, W = 2, 4, 16, 16
    x = jax.random.normal(kx, (B, C, H, W), dtype=jnp.float32)

    # Conv2d(2, 1, kernel_size=7, padding=3); kaiming_normal_(mode='fan_out'):
    # fan_out = out_channels * kh * kw = 49, std = sqrt(2/49); bias = 0.
    conv_w = jax.random.normal(kw, (1, 2, 7, 7), dtype=jnp.float32) * jnp.sqrt(2.0 / 49.0)
    conv_b = jnp.zeros((1,), dtype=jnp.float32)

    out = spatial_attention(x, conv_w, conv_b)
    out = jax.block_until_ready(out)

    ref = spatial_attention_ref(x, conv_w, conv_b)
    assert out.shape == (B, C, H, W)
    assert jnp.allclose(out, ref, atol=1e-4, rtol=1e-4), \
        f"max err {jnp.max(jnp.abs(out - ref))}"
    print("KERNEL_OK")
</pallas_src>

<mosaic_0001>
module attributes {stable_mosaic.version = 11 : i64} {
  func.func @_sa_kernel_matmul(%arg0: i32, %arg1: memref<1x4x256xf32, #tpu.memory_space<vmem>>, %arg2: memref<512x256xf32, #tpu.memory_space<vmem>>, %arg3: memref<1xf32, #tpu.memory_space<smem>>, %arg4: memref<1x4x256xf32, #tpu.memory_space<vmem>>) attributes {dimension_semantics = [#tpu.dimension_semantics<parallel>], iteration_bounds = array<i64: 2>, scalar_prefetch = 0 : i64, scratch_operands = 0 : i64, tpu.core_type = #tpu.core_type<tc>, window_params = [{transform_indices = @transform_0, window_bounds = array<i64: 1, 4, 256>}, {pipeline_mode = #tpu.pipeline_mode<synchronous>, transform_indices = @transform_1, window_bounds = array<i64: 512, 256>}, {transform_indices = @transform_2, window_bounds = array<i64: 1>}, {transform_indices = @transform_3, window_bounds = array<i64: 1, 4, 256>}]} {
    %c0 = arith.constant 0 : index
    %c0_0 = arith.constant 0 : index
    %c0_1 = arith.constant 0 : index
    %0 = vector.load %arg1[%c0, %c0_0, %c0_1] : memref<1x4x256xf32, #tpu.memory_space<vmem>>, vector<1x4x256xf32>
    %cst = arith.constant dense<0xFF800000> : vector<1x256xf32>
    %1 = vector.multi_reduction <maximumf>, %0, %cst [1] : vector<1x4x256xf32> to vector<1x256xf32>
    %cst_2 = arith.constant dense<0.000000e+00> : vector<1x256xf32>
    %2 = vector.multi_reduction <add>, %0, %cst_2 [1] : vector<1x4x256xf32> to vector<1x256xf32>
    %cst_3 = arith.constant 2.500000e-01 : f32
    %3 = vector.broadcast %cst_3 : f32 to vector<1x256xf32>
    %4 = arith.mulf %2, %3 : vector<1x256xf32>
    %5 = tpu.concatenate %1, %4 in 1 : vector<1x256xf32>, vector<1x256xf32> -> vector<1x512xf32>
    %c0_4 = arith.constant 0 : index
    %c0_5 = arith.constant 0 : index
    %6 = vector.load %arg2[%c0_4, %c0_5] : memref<512x256xf32, #tpu.memory_space<vmem>>, vector<512x256xf32>
    %cst_6 = arith.constant dense<0.000000e+00> : vector<1x256xf32>
    %7 = tpu.matmul %5, %6, %cst_6 {dimension_numbers = #tpu.dot_dimension_numbers<[1], [0], [0], [1], [0, 0, 1, 1], [], []>} : vector<1x512xf32>, vector<512x256xf32>, vector<1x256xf32> -> vector<1x256xf32>
    %c0_7 = arith.constant 0 : index
    %8 = memref.load %arg3[%c0_7] : memref<1xf32, #tpu.memory_space<smem>>
    %9 = vector.broadcast %8 : f32 to vector<1x256xf32>
    %10 = arith.addf %7, %9 : vector<1x256xf32>
    %11 = arith.negf %10 : vector<1x256xf32>
    %12 = math.exp %11 : vector<1x256xf32>
    %cst_8 = arith.constant 1.000000e+00 : f32
    %13 = vector.broadcast %cst_8 : f32 to vector<1x256xf32>
    %14 = arith.addf %13, %12 : vector<1x256xf32>
    %15 = arith.divf %13, %14 : vector<1x256xf32>
    %c0_9 = arith.constant 0 : index
    %c0_10 = arith.constant 0 : index
    %c0_11 = arith.constant 0 : index
    %16 = vector.load %arg1[%c0_9, %c0_10, %c0_11] : memref<1x4x256xf32, #tpu.memory_space<vmem>>, vector<1x4x256xf32>
    %17 = vector.shape_cast %15 : vector<1x256xf32> to vector<1x1x256xf32>
    %18 = vector.broadcast %17 : vector<1x1x256xf32> to vector<1x4x256xf32>
    %19 = arith.mulf %16, %18 : vector<1x4x256xf32>
    %c0_12 = arith.constant 0 : index
    %c0_13 = arith.constant 0 : index
    %c0_14 = arith.constant 0 : index
    %20 = vector.load %arg4[%c0_12, %c0_13, %c0_14] : memref<1x4x256xf32, #tpu.memory_space<vmem>>, vector<1x4x256xf32>
    tpu.vector_store %arg4[%c0_12, %c0_13, %c0_14], %19 {strides = array<i32>} : memref<1x4x256xf32, #tpu.memory_space<vmem>>, vector<1x4x256xf32>,
    return
  }
  func.func @transform_0(%arg0: i32) -> (i32, i32, i32) {
    %c0_i32 = arith.constant 0 : i32
    %c0_i32_0 = arith.constant 0 : i32
    %c0_i32_1 = arith.constant 0 : i32
    return %arg0, %c0_i32, %c0_i32_0 : i32, i32, i32
  }
  func.func @transform_1(%arg0: i32) -> (i32, i32) {
    %c0_i32 = arith.constant 0 : i32
    %c0_i32_0 = arith.constant 0 : i32
    %c0_i32_1 = arith.constant 0 : i32
    return %c0_i32, %c0_i32_0 : i32, i32
  }
  func.func @transform_2(%arg0: i32) -> i32 {
    %c0_i32 = arith.constant 0 : i32
    %c0_i32_0 = arith.constant 0 : i32
    return %c0_i32 : i32
  }
  func.func @transform_3(%arg0: i32) -> (i32, i32, i32) {
    %c0_i32 = arith.constant 0 : i32
    %c0_i32_0 = arith.constant 0 : i32
    %c0_i32_1 = arith.constant 0 : i32
    return %arg0, %c0_i32, %c0_i32_0 : i32, i32, i32
  }
}

</mosaic_0001>

<bundles_post_ra>
// kernel: tpu_custom_call.1
= control target key start
LH: loop header
LB: loop body
LE: loop exit
PB: predicated region body
PF: predicated region fallthrough
CT: control target
= control target key end

     0   :  { %s1096_s0 = inlined_call_operand.hbm [shape: f32[2,4,256], index: 0, kind: input, shape index: {}]   ;;  %s1097_s1 = inlined_call_operand.hbm [shape: f32[512,256], index: 1, kind: input, shape index: {}]   ;;  %s1098_s2 = inlined_call_operand.<no memory space> [shape: f32[1], index: 2, kind: input, shape index: {}]   ;;  %s1099_s3 = inlined_call_operand.hbm [shape: f32[2,4,256], index: 3, kind: output, shape index: {}]  }
   0x1   :  { %8 = sst [smem:[#allocation2]] %s1098_s2 }
   0x2   :  { %9 = vsyncpa [#allocation4], 0 }
   0x3   :  { %11 = vsyncpa [#allocation4 + $0x1], 0 }
   0x4   :  { %12 = vsyncpa [#allocation7], 0 }
   0x5   :  { %13 = vsyncpa [#allocation5], 0 }
   0x6   :  { %15 = vsyncpa [#allocation5 + $0x1], 0  ;;  %s929_s14 = smov 0   ;;  %s931_s15 = smov 0  }
   0x7   :  { %s933_s16 = smov 0   ;;  %s935_s17 = smov 0  }
   0x8 LB: > { %s131_s19 = sshll.u32 %s1097_s1, 4  ;;  %s953_s20 = sadd.s32 4294967295, %s901_s17   ;;  %s901_s17 = sphi %s935_s17, %s1111_s17   ;;  %s897_s16 = sphi %s933_s16, %s1110_s16   ;;  %s893_s15 = sphi %s931_s15, %s1109_s15   ;;  %s889_s14 = sphi %s929_s14, %s1108_s14   ;;  %s132_s19 = int_to_ptr.hbm [resolvable:$true] %s131_s19 }
   0x9   : > { %p685_p0 = scmp.ge.s32.totalorder %s901_s17, 1  ;;  %p42_p1 = scmp.eq.s32.totalorder %s953_s20, 0 }
   0xa   : > { %p120_p2 = scmp.lt.s32.totalorder %s901_s17, 3  ;;  %s903_s22 = smov [#allocation6]  }
   0xb   : > { %s133_s23 = sshll.u32 %s903_s22, 4  ;;  %s904_s24 = smov 256   ;;  %s134_s23 = int_to_ptr.vmem [resolvable:$true] %s133_s23 }
   0xc   : > { %p958_p3 = pnand %p685_p0, %p120_p2  ;;  %s905_s25 = smov 16  }
   0xd   : > { %s684_s26 = sadd.s32 4294967294, %s901_s17   ;;  %s969_s27 = sadd.s32 1, %s901_s17  }
   0xe   : > { %p712_p4 = pneg %p958_p3  ;;  %s28_s28 = sadd.s32 1, %s897_s16 }
   0xf   : > { %s25_s29 = ssub.s32 %s901_s17, %s969_s27  ;;  %p35_p7 = scmp.ne.s32.totalorder %s897_s16, %s893_s15 }
  0x10   : > { %p713_p6 = pnand %p712_p4, %p42_p1  ;;  %p26_p8 = scmp.eq.s32.totalorder %s25_s29, 0 }
  0x11   : > { %p36_p9 = scmp.eq.s32.totalorder %s901_s17, 0  ;;  %p41_p10 = scmp.ne.s32.totalorder %s893_s15, %s889_s14 }
  0x12   : > { %715 = dma.hbm_to_vmem [thread:$0]  (!%p713_p6), %s132_s19, 16384, %s134_s23, [#allocation7], %s904_s24, %s904_s24, %s905_s25  }
  0x13   : > { %p107_p11 = scmp.eq.s32.totalorder %s953_s20, 1  ;;  %p985_p12 = por %p42_p1, %p41_p10 }
  0x14   : > { %s981_s30 = scalar_select %p26_p8, %s897_s16, %s28_s28  }
  0x15   : > { %p989_p13 = por %p107_p11, %p35_p7  ;;  %p113_p0 = scmp.eq.s32.totalorder %s684_s26, 1 }
  0x16   : > { %p37_p2 = por %p36_p9, %p35_p7  ;;  %s150_s6 = sand.u32 1, %s897_s16  }
  0x17   : > { %p994_p4 = por %p113_p0, %p41_p10  ;;  %p725_p6 = scmp.lt.s32.totalorder %s901_s17, 2 }
  0x18   : > { %s688_s8 = sshll.u32 %s150_s6, 3  ;;  %s702_s9 = sshll.u32 %s901_s17, 3 }
  0x19   : > { %s159_s12 = scalar_lea.hbm %s1096_s0, %s702_s9  ;;  %s154_s2 = scalar_lea.vmem [#allocation3], %s688_s8 }
  0x1a   : > { %s161_s13 = sshll.u32 %s159_s12, 4  ;;  %s163_s18 = sshll.u32 %s154_s2, 4  ;;  %s162_s13 = int_to_ptr.hbm [resolvable:$true] %s161_s13  ;;  %s164_s18 = int_to_ptr.vmem [resolvable:$true] %s163_s18 }
  0x1b   : > { %p1003_p8 = pnand %p725_p6, %p37_p2  ;;  %s151_s22 = scalar_lea.sflag [#allocation4], %s150_s6 }
  0x1c   : > { %s801_s23 = sshra.s32 %s162_s13, 4  ;;  %s808_s28 = scalar_lea.hbm %s1096_s0, 16  ;;  %s802_s23 = int_to_ptr.hbm [resolvable:$true] %s801_s23 }
  0x1d   : > { %s803_s24 = scalar_lea.hbm %s802_s23, 8  ;;  %p805_p9 = pneg %p1003_p8 }
  0x1e   : > { %p804_p7 = scmp.ne.s32.totalorder %s802_s23, %s803_s24  ;;  %p809_p0 = scmp.lt.s32.totalorder %s802_s23, %s1096_s0 }
  0x1f   : > { %p810_p2 = scmp.lt.s32.totalorder %s808_s28, %s803_s24 }
  0x20   : > { %p806_p10 = pnand %p805_p9, %p804_p7 }
  0x21   : > { %p811_p6 = por %p810_p2, %p809_p0 }
  0x22   : > { %p807_p11 = pneg %p806_p10 }
  0x24   : > { %p812_p5 = pnand %p811_p6, %p807_p11 }
  0x26   : > { %815 = shalt.err (!%p812_p5)
}
  0x27   : > { %719 = dma.hbm_to_vmem [thread:$0]  (!%p1003_p8), %s162_s13, 128, %s164_s18, %s151_s22  }
  0x28   : > { %172 = sbr.rel (%p958_p3) target bundleno = 292 (0x124), region = 32  ;;  %s1020_s6 = sand.u32 (!%p958_p3), 1, %s893_s15  }
  0x29   : > { %s692_s9 = sshll.u32 (!%p958_p3), %s1020_s6, 3  ;;  %s175_s10 = scalar_lea.sflag (!%p958_p3), [#allocation4], %s1020_s6 }
  0x2a   : > { %s1026_s11 = scalar_lea.vmem (!%p958_p3), [#allocation3], %s692_s9 }
  0x2d   : > { %876 = dma.done.wait (%p985_p12), %s175_s10, 128  }
  0x2e   : > { %878 = vsyncadd (%p985_p12), %s175_s10, 4294967168 }
  0x2f   : > { %880 = dma.done.wait (%p42_p1), [#allocation7], 16384  }
  0x30   : > { %882 = vsyncadd (%p42_p1), [#allocation7], 4294950912  ;;  %v344_v0 = vld [vmem:[#allocation6 + $0x2f0] sm:$0xff]  ;;  %v342_v2 = vld [vmem:[#allocation6 + $0x2e0] sm:$0xff]  ;;  %vm214_vm0 = vcmask 1043456   ;;  %s378_s21 = sld [smem:[#allocation2]] }
  0x31   : > { %v280_v1 = vld [vmem:[#allocation6 + $0xf0] sm:$0xff]  ;;  %420 = vmatpush.msra.mxu2 %v344_v0  ;;  %v278_v4 = vld [vmem:[#allocation6 + $0xe0] sm:$0xff]  ;;  %v345_v63 = vld [vmem:[#allocation6 + $0x2f8] sm:$0xff]  ;;  %s703_s4 = sshll.u32 %s953_s20, 3  ;;  %s206_s18 = scalar_lea.vmem [#allocation8], %s692_s9 }
  0x32   : > { %380 = vmatpush.msra.mxu0 %v280_v1  ;;  %v376_v3 = vld [vmem:[#allocation6 + $0x3f0] sm:$0xff]  ;;  %v374_v7 = vld [vmem:[#allocation6 + $0x3e0] sm:$0xff]  ;;  %v281_v1 = vld [vmem:[#allocation6 + $0xf8] sm:$0xff]  ;;  %s599_s2 = scalar_lea.hbm %s1099_s3, %s703_s4  ;;  %s601_s19 = sshll.u32 %s206_s18, 4  ;;  %s602_s19 = int_to_ptr.vmem [resolvable:$true] %s601_s19 }
  0x33   : > { %v312_v5 = vld [vmem:[#allocation6 + $0x1f0] sm:$0xff]  ;;  %440 = vmatpush.msra.mxu3 %v376_v3  ;;  %421 = vmatpush.msra.mxu2 %v342_v2  ;;  %v310_v9 = vld [vmem:[#allocation6 + $0x1e0] sm:$0xff]  ;;  %v377_v2 = vld [vmem:[#allocation6 + $0x3f8] sm:$0xff]  ;;  %s603_s22 = sshll.u32 %s599_s2, 4  ;;  %s588_s20 = scalar_lea.sflag [#allocation5], %s1020_s6  ;;  %s604_s22 = int_to_ptr.hbm [resolvable:$true] %s603_s22 }
  0x34   : > { %400 = vmatpush.msra.mxu1 %v312_v5  ;;  %v340_v6 = vld [vmem:[#allocation6 + $0x2d0] sm:$0xff]  ;;  %381 = vmatpush.msra.mxu0 %v278_v4  ;;  %v338_v11 = vld [vmem:[#allocation6 + $0x2c0] sm:$0xff]  ;;  %v343_v3 = vld [vmem:[#allocation6 + $0x2e8] sm:$0xff]  ;;  %s845_s23 = sshra.s32 %s604_s22, 4  ;;  %s851_s28 = scalar_lea.hbm %s1099_s3, 16  ;;  %s846_s23 = int_to_ptr.hbm [resolvable:$true] %s845_s23 }
  0x35   : > { %v276_v8 = vld [vmem:[#allocation6 + $0xd0] sm:$0xff]  ;;  %441 = vmatpush.msra.mxu3 %v374_v7  ;;  %v274_v12 = vld [vmem:[#allocation6 + $0xc0] sm:$0xff]  ;;  %422 = vmatpush.msra.mxu2 %v340_v6  ;;  %v279_v5 = vld [vmem:[#allocation6 + $0xe8] sm:$0xff]  ;;  %s847_s24 = scalar_lea.hbm %s846_s23, 8  ;;  %p852_p12 = scmp.lt.s32.totalorder %s846_s23, %s1099_s3 }
  0x36   : > { %v372_v10 = vld [vmem:[#allocation6 + $0x3d0] sm:$0xff]  ;;  %401 = vmatpush.msra.mxu1 %v310_v9  ;;  %382 = vmatpush.msra.mxu0 %v276_v8  ;;  %v370_v14 = vld [vmem:[#allocation6 + $0x3c0] sm:$0xff]  ;;  %v313_v6 = vld [vmem:[#allocation6 + $0x1f8] sm:$0xff]  ;;  %p848_p1 = scmp.ne.s32.totalorder %s846_s23, %s847_s24  ;;  %p853_p8 = scmp.lt.s32.totalorder %s851_s28, %s847_s24 }
  0x37   : > { %v308_v13 = vld [vmem:[#allocation6 + $0x1d0] sm:$0xff]  ;;  %v306_v15 = vld [vmem:[#allocation6 + $0x1c0] sm:$0xff]  ;;  %442 = vmatpush.msra.mxu3 %v372_v10  ;;  %423 = vmatpush.msra.mxu2 %v338_v11  ;;  %v341_v7 = vld [vmem:[#allocation6 + $0x2d8] sm:$0xff] }
  0x38   : > { %402 = vmatpush.msra.mxu1 %v308_v13  ;;  %v336_v16 = vld [vmem:[#allocation6 + $0x2b0] sm:$0xff]  ;;  %383 = vmatpush.msra.mxu0 %v274_v12  ;;  %v334_v20 = vld [vmem:[#allocation6 + $0x2a0] sm:$0xff]  ;;  %v375_v8 = vld [vmem:[#allocation6 + $0x3e8] sm:$0xff]  ;;  %p849_p3 = pnand %p848_p1, %p989_p13  ;;  %p854_p7 = por %p853_p8, %p852_p12 }
  0x39   : > { %v272_v17 = vld [vmem:[#allocation6 + $0xb0] sm:$0xff]  ;;  %443 = vmatpush.msra.mxu3 %v370_v14  ;;  %v270_v21 = vld [vmem:[#allocation6 + $0xa0] sm:$0xff]  ;;  %424 = vmatpush.msra.mxu2 %v336_v16  ;;  %v277_v9 = vld [vmem:[#allocation6 + $0xd8] sm:$0xff] }
  0x3a   : > { %v368_v18 = vld [vmem:[#allocation6 + $0x3b0] sm:$0xff]  ;;  %403 = vmatpush.msra.mxu1 %v306_v15  ;;  %384 = vmatpush.msra.mxu0 %v272_v17  ;;  %v366_v22 = vld [vmem:[#allocation6 + $0x3a0] sm:$0xff]  ;;  %v311_v10 = vld [vmem:[#allocation6 + $0x1e8] sm:$0xff]  ;;  %p850_p5 = pneg %p849_p3 }
  0x3b   : > { %v304_v19 = vld [vmem:[#allocation6 + $0x1b0] sm:$0xff]  ;;  %v302_v23 = vld [vmem:[#allocation6 + $0x1a0] sm:$0xff]  ;;  %444 = vmatpush.msra.mxu3 %v368_v18  ;;  %425 = vmatpush.msra.mxu2 %v334_v20  ;;  %v339_v13 = vld [vmem:[#allocation6 + $0x2c8] sm:$0xff] }
  0x3c   : > { %404 = vmatpush.msra.mxu1 %v304_v19  ;;  %v332_v24 = vld [vmem:[#allocation6 + $0x290] sm:$0xff]  ;;  %385 = vmatpush.msra.mxu0 %v270_v21  ;;  %v330_v28 = vld [vmem:[#allocation6 + $0x280] sm:$0xff]  ;;  %v373_v14 = vld [vmem:[#allocation6 + $0x3d8] sm:$0xff]  ;;  %p855_p9 = pnand %p854_p7, %p850_p5 }
  0x3d   : > { %v268_v25 = vld [vmem:[#allocation6 + $0x90] sm:$0xff]  ;;  %445 = vmatpush.msra.mxu3 %v366_v22  ;;  %v266_v29 = vld [vmem:[#allocation6 + $0x80] sm:$0xff]  ;;  %426 = vmatpush.msra.mxu2 %v332_v24  ;;  %v275_v17 = vld [vmem:[#allocation6 + $0xc8] sm:$0xff] }
  0x3e   : > { %v364_v26 = vld [vmem:[#allocation6 + $0x390] sm:$0xff]  ;;  %405 = vmatpush.msra.mxu1 %v302_v23  ;;  %386 = vmatpush.msra.mxu0 %v268_v25  ;;  %v362_v30 = vld [vmem:[#allocation6 + $0x380] sm:$0xff]  ;;  %v309_v18 = vld [vmem:[#allocation6 + $0x1d8] sm:$0xff] }
  0x3f   : > { %v300_v27 = vld [vmem:[#allocation6 + $0x190] sm:$0xff]  ;;  %v298_v31 = vld [vmem:[#allocation6 + $0x180] sm:$0xff]  ;;  %446 = vmatpush.msra.mxu3 %v364_v26  ;;  %427 = vmatpush.msra.mxu2 %v330_v28  ;;  %v337_v21 = vld [vmem:[#allocation6 + $0x2b8] sm:$0xff] }
  0x40   : > { %406 = vmatpush.msra.mxu1 %v300_v27  ;;  %v328_v32 = vld [vmem:[#allocation6 + $0x270] sm:$0xff]  ;;  %387 = vmatpush.msra.mxu0 %v266_v29  ;;  %v326_v36 = vld [vmem:[#allocation6 + $0x260] sm:$0xff]  ;;  %v371_v22 = vld [vmem:[#allocation6 + $0x3c8] sm:$0xff] }
  0x41   : > { %v264_v33 = vld [vmem:[#allocation6 + $0x70] sm:$0xff]  ;;  %447 = vmatpush.msra.mxu3 %v362_v30  ;;  %v262_v37 = vld [vmem:[#allocation6 + $0x60] sm:$0xff]  ;;  %428 = vmatpush.msra.mxu2 %v328_v32  ;;  %v273_v23 = vld [vmem:[#allocation6 + $0xb8] sm:$0xff] }
  0x42   : > { %v360_v34 = vld [vmem:[#allocation6 + $0x370] sm:$0xff]  ;;  %407 = vmatpush.msra.mxu1 %v298_v31  ;;  %388 = vmatpush.msra.mxu0 %v264_v33  ;;  %v358_v38 = vld [vmem:[#allocation6 + $0x360] sm:$0xff]  ;;  %v307_v24 = vld [vmem:[#allocation6 + $0x1c8] sm:$0xff] }
  0x43   : > { %v296_v35 = vld [vmem:[#allocation6 + $0x170] sm:$0xff]  ;;  %v294_v39 = vld [vmem:[#allocation6 + $0x160] sm:$0xff]  ;;  %448 = vmatpush.msra.mxu3 %v360_v34  ;;  %429 = vmatpush.msra.mxu2 %v326_v36  ;;  %v335_v27 = vld [vmem:[#allocation6 + $0x2a8] sm:$0xff] }
  0x44   : > { %408 = vmatpush.msra.mxu1 %v296_v35  ;;  %v324_v40 = vld [vmem:[#allocation6 + $0x250] sm:$0xff]  ;;  %389 = vmatpush.msra.mxu0 %v262_v37  ;;  %v322_v44 = vld [vmem:[#allocation6 + $0x240] sm:$0xff]  ;;  %v369_v28 = vld [vmem:[#allocation6 + $0x3b8] sm:$0xff] }
  0x45   : > { %v260_v41 = vld [vmem:[#allocation6 + $0x50] sm:$0xff]  ;;  %449 = vmatpush.msra.mxu3 %v358_v38  ;;  %v258_v45 = vld [vmem:[#allocation6 + $0x40] sm:$0xff]  ;;  %430 = vmatpush.msra.mxu2 %v324_v40  ;;  %v271_v30 = vld [vmem:[#allocation6 + $0xa8] sm:$0xff] }
  0x46   : > { %v356_v42 = vld [vmem:[#allocation6 + $0x350] sm:$0xff]  ;;  %409 = vmatpush.msra.mxu1 %v294_v39  ;;  %390 = vmatpush.msra.mxu0 %v260_v41  ;;  %v354_v46 = vld [vmem:[#allocation6 + $0x340] sm:$0xff]  ;;  %v305_v31 = vld [vmem:[#allocation6 + $0x1b8] sm:$0xff] }
  0x47   : > { %v292_v43 = vld [vmem:[#allocation6 + $0x150] sm:$0xff]  ;;  %v290_v47 = vld [vmem:[#allocation6 + $0x140] sm:$0xff]  ;;  %450 = vmatpush.msra.mxu3 %v356_v42  ;;  %431 = vmatpush.msra.mxu2 %v322_v44  ;;  %v333_v32 = vld [vmem:[#allocation6 + $0x298] sm:$0xff] }
  0x48   : > { %410 = vmatpush.msra.mxu1 %v292_v43  ;;  %v320_v48 = vld [vmem:[#allocation6 + $0x230] sm:$0xff]  ;;  %391 = vmatpush.msra.mxu0 %v258_v45  ;;  %v318_v52 = vld [vmem:[#allocation6 + $0x220] sm:$0xff]  ;;  %v367_v34 = vld [vmem:[#allocation6 + $0x3a8] sm:$0xff] }
  0x49   : > { %v256_v49 = vld [vmem:[#allocation6 + $0x30] sm:$0xff]  ;;  %451 = vmatpush.msra.mxu3 %v354_v46  ;;  %v254_v53 = vld [vmem:[#allocation6 + $0x20] sm:$0xff]  ;;  %432 = vmatpush.msra.mxu2 %v320_v48  ;;  %v269_v35 = vld [vmem:[#allocation6 + $0x98] sm:$0xff] }
  0x4a   : > { %v352_v50 = vld [vmem:[#allocation6 + $0x330] sm:$0xff]  ;;  %411 = vmatpush.msra.mxu1 %v290_v47  ;;  %392 = vmatpush.msra.mxu0 %v256_v49  ;;  %v350_v54 = vld [vmem:[#allocation6 + $0x320] sm:$0xff]  ;;  %v303_v36 = vld [vmem:[#allocation6 + $0x1a8] sm:$0xff] }
  0x4b   : > { %v288_v51 = vld [vmem:[#allocation6 + $0x130] sm:$0xff]  ;;  %v286_v55 = vld [vmem:[#allocation6 + $0x120] sm:$0xff]  ;;  %452 = vmatpush.msra.mxu3 %v352_v50  ;;  %433 = vmatpush.msra.mxu2 %v318_v52  ;;  %v331_v43 = vld [vmem:[#allocation6 + $0x288] sm:$0xff] }
  0x4c   : > { %412 = vmatpush.msra.mxu1 %v288_v51  ;;  %v316_v56 = vld [vmem:[#allocation6 + $0x210] sm:$0xff]  ;;  %393 = vmatpush.msra.mxu0 %v254_v53  ;;  %v314_v61 = vld [vmem:[#allocation6 + $0x200] sm:$0xff]  ;;  %v365_v48 = vld [vmem:[#allocation6 + $0x398] sm:$0xff] }
  0x4d   : > { %v252_v57 = vld [vmem:[#allocation6 + $0x10] sm:$0xff]  ;;  %453 = vmatpush.msra.mxu3 %v350_v54  ;;  %v250_v62 = vld [vmem:[#allocation6] sm:$0xff]  ;;  %434 = vmatpush.msra.mxu2 %v316_v56  ;;  %v267_v49 = vld [vmem:[#allocation6 + $0x88] sm:$0xff] }
  0x4e   : > { %v1037_v58 = vld [vmem:[%s1026_s11] sm:$0xff]  ;;  %413 = vmatpush.msra.mxu1 %v286_v55  ;;  %394 = vmatpush.msra.mxu0 %v252_v57  ;;  %v346_v0 = vld [vmem:[#allocation6 + $0x300] sm:$0xff]  ;;  %v363_v56 = vld [vmem:[#allocation6 + $0x388] sm:$0xff] }
  0x4f   : > { %v348_v59 = vld [vmem:[#allocation6 + $0x310] sm:$0xff]  ;;  %209 = vst [vmem:[#allocation1] ss:$2 sm:$0xff] %v1037_v58  ;;  %435 = vmatpush.msra.mxu2 %v314_v61  ;;  %v282_v4 = vld [vmem:[#allocation6 + $0x100] sm:$0xff]  ;;  %v301_v54 = vld [vmem:[#allocation6 + $0x198] sm:$0xff] }
  0x50   : > { %v284_v60 = vld [vmem:[#allocation6 + $0x110] sm:$0xff]  ;;  %454 = vmatpush.msra.mxu3 %v348_v59  ;;  %395 = vmatpush.msra.mxu0 %v250_v62  ;;  %v329_v55 = vld [vmem:[#allocation6 + $0x278] sm:$0xff]  ;;  %v299_v61 = vld [vmem:[#allocation6 + $0x188] sm:$0xff] }
  0x51   : > { %414 = vmatpush.msra.mxu1 %v284_v60  ;;  %500 = vmatpush.msrb.mxu2 %v345_v63  ;;  %v265_v57 = vld [vmem:[#allocation6 + $0x78] sm:$0xff]  ;;  %v327_v62 = vld [vmem:[#allocation6 + $0x268] sm:$0xff] }
  0x52   : > { %455 = vmatpush.msra.mxu3 %v346_v0  ;;  %460 = vmatpush.msrb.mxu0 %v281_v1  ;;  %v361_v63 = vld [vmem:[#allocation6 + $0x378] sm:$0xff]  ;;  %v263_v0 = vld [vmem:[#allocation6 + $0x68] sm:$0xff] }
  0x53   : > { %501 = vmatpush.msrb.mxu2 %v343_v3  ;;  %415 = vmatpush.msra.mxu1 %v282_v4  ;;  %v297_v3 = vld [vmem:[#allocation6 + $0x178] sm:$0xff] }
  0x54   : > { %520 = vmatpush.msrb.mxu3 %v377_v2  ;;  %461 = vmatpush.msrb.mxu0 %v279_v5  ;;  %v325_v4 = vld [vmem:[#allocation6 + $0x258] sm:$0xff]  ;;  %v359_v5 = vld [vmem:[#allocation6 + $0x368] sm:$0xff] }
  0x55   : > { %480 = vmatpush.msrb.mxu1 %v313_v6  ;;  %502 = vmatpush.msrb.mxu2 %v341_v7  ;;  %v261_v6 = vld [vmem:[#allocation6 + $0x58] sm:$0xff] }
  0x56   : > { %v210_v11 = vld.sshfl [vmem:[#allocation1] sm:$0xff pattern:$0x75316420]  ;;  %v211_v12 = vld.sshfl [vmem:[#allocation1 + $0x8] sm:$0xff pattern:$0x75316420]  ;;  %521 = vmatpush.msrb.mxu3 %v375_v8  ;;  %462 = vmatpush.msrb.mxu0 %v277_v9 }
  0x57   : > { %229 = vst [vmem:[#allocation1] ss:$2 sm:$0xff] %v1037_v58  ;;  %v215_v15 = vsel %vm214_vm0, %v210_v11, -inf  ;;  %v222_v16 = vsel %vm214_vm0, %v211_v12, -inf  ;;  %481 = vmatpush.msrb.mxu1 %v311_v10  ;;  %503 = vmatpush.msrb.mxu2 %v339_v13  ;;  %v295_v9 = vld [vmem:[#allocation6 + $0x168] sm:$0xff]  ;;  %v357_v11 = vld [vmem:[#allocation6 + $0x358] sm:$0xff] }
  0x58   : > { %v216_v19 = vrot.slane %v215_v15, 4  ;;  %v223_v20 = vrot.slane %v222_v16, 4  ;;  %522 = vmatpush.msrb.mxu3 %v373_v14  ;;  %463 = vmatpush.msrb.mxu0 %v275_v17  ;;  %v323_v10 = vld [vmem:[#allocation6 + $0x248] sm:$0xff] }
  0x59   : > { %482 = vmatpush.msrb.mxu1 %v309_v18  ;;  %504 = vmatpush.msrb.mxu2 %v337_v21  ;;  %v259_v12 = vld [vmem:[#allocation6 + $0x48] sm:$0xff] }
  0x5a   : > { %v217_v25 = vmax.f32 %v215_v15, %v216_v19  ;;  %v224_v26 = vmax.f32 %v222_v16, %v223_v20  ;;  %523 = vmatpush.msrb.mxu3 %v371_v22  ;;  %464 = vmatpush.msrb.mxu0 %v273_v23  ;;  %v293_v15 = vld [vmem:[#allocation6 + $0x158] sm:$0xff]  ;;  %v355_v19 = vld [vmem:[#allocation6 + $0x348] sm:$0xff] }
  0x5b   : > { %483 = vmatpush.msrb.mxu1 %v307_v24  ;;  %505 = vmatpush.msrb.mxu2 %v335_v27  ;;  %v321_v16 = vld [vmem:[#allocation6 + $0x238] sm:$0xff]  ;;  %v291_v21 = vld [vmem:[#allocation6 + $0x148] sm:$0xff] }
  0x5c   : > { %v218_v29 = vrot.slane %v217_v25, 2  ;;  %v225_v33 = vrot.slane %v224_v26, 2  ;;  %524 = vmatpush.msrb.mxu3 %v369_v28  ;;  %465 = vmatpush.msrb.mxu0 %v271_v30  ;;  %v257_v20 = vld [vmem:[#allocation6 + $0x38] sm:$0xff]  ;;  %v319_v22 = vld [vmem:[#allocation6 + $0x228] sm:$0xff] }
  0x5d   : > { %484 = vmatpush.msrb.mxu1 %v305_v31  ;;  %506 = vmatpush.msrb.mxu2 %v333_v32  ;;  %v353_v23 = vld [vmem:[#allocation6 + $0x338] sm:$0xff]  ;;  %v255_v24 = vld [vmem:[#allocation6 + $0x28] sm:$0xff] }
  0x5e   : > { %v230_v37 = vld.sshfl [vmem:[#allocation1] sm:$0xff pattern:$0x75316420]  ;;  %v219_v38 = vmax.f32 %v217_v25, %v218_v29  ;;  %v231_v39 = vld.sshfl [vmem:[#allocation1 + $0x8] sm:$0xff pattern:$0x75316420]  ;;  %v226_v40 = vmax.f32 %v224_v26, %v225_v33  ;;  %525 = vmatpush.msrb.mxu3 %v367_v34  ;;  %466 = vmatpush.msrb.mxu0 %v269_v35 }
  0x5f   : > { %v234_v41 = vsel %vm214_vm0, %v230_v37, 0.0  ;;  %v241_v42 = vsel %vm214_vm0, %v231_v39, 0.0  ;;  %485 = vmatpush.msrb.mxu1 %v303_v36  ;;  %507 = vmatpush.msrb.mxu2 %v331_v43  ;;  %v289_v25 = vld [vmem:[#allocation6 + $0x138] sm:$0xff]  ;;  %v351_v27 = vld [vmem:[#allocation6 + $0x328] sm:$0xff]  ;;  %v379_v36 = vstv %s378_s21 }
  0x60   : > { %v235_v44 = vrot.slane %v234_v41, 4  ;;  %v220_v45 = vrot.slane %v219_v38, 1  ;;  %v242_v46 = vrot.slane %v241_v42, 4  ;;  %v227_v47 = vrot.slane %v226_v40, 1  ;;  %526 = vmatpush.msrb.mxu3 %v365_v48  ;;  %467 = vmatpush.msrb.mxu0 %v267_v49  ;;  %v317_v26 = vld [vmem:[#allocation6 + $0x218] sm:$0xff]  ;;  %v287_v29 = vld [vmem:[#allocation6 + $0x128] sm:$0xff] }
  0x61   : > { %486 = vmatpush.msrb.mxu1 %v301_v54  ;;  %508 = vmatpush.msrb.mxu2 %v329_v55  ;;  %v253_v28 = vld [vmem:[#allocation6 + $0x18] sm:$0xff]  ;;  %v315_v30 = vld [vmem:[#allocation6 + $0x208] sm:$0xff] }
  0x62   : > { %v236_v50 = vadd.f32 %v235_v44, %v234_v41  ;;  %v1045_v51 = vmax.f32 %v219_v38, %v220_v45  ;;  %v243_v52 = vadd.f32 %v242_v46, %v241_v42  ;;  %v1047_v53 = vmax.f32 %v226_v40, %v227_v47  ;;  %527 = vmatpush.msrb.mxu3 %v363_v56  ;;  %v349_v31 = vld [vmem:[#allocation6 + $0x318] sm:$0xff]  ;;  %v251_v32 = vld [vmem:[#allocation6 + $0x8] sm:$0xff] }
  0x63   : > { %468 = vmatpush.msrb.mxu0 %v265_v57  ;;  %487 = vmatpush.msrb.mxu1 %v299_v61  ;;  %v285_v33 = vld [vmem:[#allocation6 + $0x118] sm:$0xff]  ;;  %v347_v34 = vld [vmem:[#allocation6 + $0x308] sm:$0xff] }
  0x64   : > { %v237_v59 = vrot.slane %v236_v50, 2  ;;  %396 = vmatmul.f32.vlgmr.msra.gmra.mxu0 %v1045_v51  ;;  %v244_v60 = vrot.slane %v243_v52, 2  ;;  %416 = vmatmul.f32.vlgmr.msra.gmra.mxu1 %v1047_v53  ;;  %v283_v35 = vld [vmem:[#allocation6 + $0x108] sm:$0xff] }
  0x65   : > { %509 = vmatpush.msrb.mxu2 %v327_v62  ;;  %528 = vmatpush.msrb.mxu3 %v361_v63 }
  0x66   : > { %v238_v1 = vadd.f32 %v237_v59, %v236_v50  ;;  %v245_v2 = vadd.f32 %v244_v60, %v243_v52  ;;  %469 = vmatpush.msrb.mxu0 %v263_v0  ;;  %488 = vmatpush.msrb.mxu1 %v297_v3 }
  0x67   : > { %510 = vmatpush.msrb.mxu2 %v325_v4  ;;  %529 = vmatpush.msrb.mxu3 %v359_v5 }
  0x68   : > { %v239_v7 = vrot.slane %v238_v1, 1  ;;  %v246_v8 = vrot.slane %v245_v2, 1  ;;  %470 = vmatpush.msrb.mxu0 %v261_v6  ;;  %489 = vmatpush.msrb.mxu1 %v295_v9 }
  0x69   : > { %511 = vmatpush.msrb.mxu2 %v323_v10  ;;  %530 = vmatpush.msrb.mxu3 %v357_v11 }
  0x6a   : > { %v240_v13 = vadd.f32 %v239_v7, %v238_v1  ;;  %v247_v14 = vadd.f32 %v246_v8, %v245_v2  ;;  %471 = vmatpush.msrb.mxu0 %v259_v12  ;;  %490 = vmatpush.msrb.mxu1 %v293_v15 }
  0x6b   : > { %512 = vmatpush.msrb.mxu2 %v321_v16  ;;  %531 = vmatpush.msrb.mxu3 %v355_v19 }
  0x6c   : > { %v248_v17 = vmul.f32 0.25, %v240_v13  ;;  %v249_v18 = vmul.f32 0.25, %v247_v14  ;;  %472 = vmatpush.msrb.mxu0 %v257_v20  ;;  %491 = vmatpush.msrb.mxu1 %v291_v21 }
  0x6d   : > { %513 = vmatpush.msrb.mxu2 %v319_v22  ;;  %532 = vmatpush.msrb.mxu3 %v353_v23 }
  0x6e   : > { %436 = vmatmul.f32.vlgmr.msra.gmra.mxu2 %v248_v17  ;;  %456 = vmatmul.f32.vlgmr.msra.gmra.mxu3 %v249_v18 }
  0x6f   : > { %473 = vmatpush.msrb.mxu0 %v255_v24  ;;  %492 = vmatpush.msrb.mxu1 %v289_v25 }
  0x70   : > { %514 = vmatpush.msrb.mxu2 %v317_v26  ;;  %533 = vmatpush.msrb.mxu3 %v351_v27 }
  0x71   : > { %474 = vmatpush.msrb.mxu0 %v253_v28  ;;  %493 = vmatpush.msrb.mxu1 %v287_v29 }
  0x72   : > { %515 = vmatpush.msrb.mxu2 %v315_v30  ;;  %534 = vmatpush.msrb.mxu3 %v349_v31 }
  0x73   : > { %475 = vmatpush.msrb.mxu0 %v251_v32  ;;  %494 = vmatpush.msrb.mxu1 %v285_v33 }
  0x74   : > { %535 = vmatpush.msrb.mxu3 %v347_v34  ;;  %476 = vmatmul.f32.vlgmr.msrb.gmra.mxu0 %v1045_v51 }
  0x75   : > { %495 = vmatpush.msrb.mxu1 %v283_v35 }
  0x76   : > { %516 = vmatmul.f32.vlgmr.msrb.gmra.mxu2 %v248_v17  ;;  %536 = vmatmul.f32.vlgmr.msrb.gmra.mxu3 %v249_v18 }
  0x77   : > { %496 = vmatmul.f32.vlgmr.msrb.gmra.mxu1 %v1047_v53 }
  0xe1   : > { %v397_v37 = vpop.f32.mrf.mxu0  ;;  %v417_v39 = vpop.f32.mrf.mxu1 }
  0xe2   : > { %v398_v38 = vadd.f32 %v397_v37, %v379_v36 }
  0xe4   : > { %v418_v40 = vadd.f32 %v417_v39, %v398_v38 }
  0xf1   : > { %v437_v41 = vpop.f32.mrf.mxu2  ;;  %v457_v42 = vpop.f32.mrf.mxu3 }
  0xf2   : > { %v438_v43 = vadd.f32 %v437_v41, %v418_v40  ;;  %v477_v45 = vpop.f32.mrf.mxu0 }
  0xf3   : > { %v478_v46 = vadd.f32 %v477_v45, %v379_v36 }
  0xf4   : > { %v458_v44 = vadd.f32 %v457_v42, %v438_v43  ;;  %v497_v48 = vpop.f32.mrf.mxu1 }
  0xf5   : > { %v498_v49 = vadd.f32 %v497_v48, %v478_v46 }
  0xf6   : > { %v695_v47 = vmul.f32 -1.442695, %v458_v44 }
  0xf8   : > { %763 = vpow2.f32 %v695_v47 }
  0xf9   : > { %v517_v50 = vpop.f32.mrf.mxu2  ;;  %v537_v52 = vpop.f32.mrf.mxu3 }
  0xfa   : > { %v518_v51 = vadd.f32 %v517_v50, %v498_v49 }
  0xfc   : > { %v538_v53 = vadd.f32 %v537_v52, %v518_v51 }
  0xfe   : > { %v764_v54 = vpop.eup %763  ;;  %v696_v55 = vmul.f32 -1.442695, %v538_v53 }
  0xff   : > { %v546_v56 = vadd.f32 1.0, %v764_v54 }
 0x100   : > { %765 = vpow2.f32 %v696_v55 }
 0x101   : > { %767 = vrcp.f32 %v546_v56  ;;  %vm553_vm1 = vweird.f32 %v546_v56  ;;  %v559_v2 = vand.u32 2147483648, %v546_v56  ;;  %v557_v4 = vand.u32 2147483647, %v546_v56 }
 0x103   : > { %v560_v10 = vor.u32 1.1754944e-38, %v559_v2  ;;  %vm558_vm5 = vcmp.eq.f32.partialorder %v557_v4, 8.507059e+37 }
 0x106   : > { %v766_v57 = vpop.eup %765 }
 0x107   : > { %v768_v59 = vpop.eup %767  ;;  %v547_v60 = vadd.f32 1.0, %v766_v57 }
 0x108   : > { %v549_v61 = vmul.f32 %v768_v59, %v546_v56  ;;  %vm554_vm2 = vweird.f32 %v768_v59 }
 0x109   : > { %769 = vrcp.f32 %v547_v60  ;;  %vm1053_vm3 = vmor %vm553_vm1, %vm554_vm2  ;;  %v574_v7 = vand.u32 2147483648, %v547_v60  ;;  %v572_v9 = vand.u32 2147483647, %v547_v60  ;;  %vm568_vm6 = vweird.f32 %v547_v60 }
 0x10a   : > { %v550_v62 = vsub.f32 1.0, %v549_v61 }
 0x10b   : > { %v575_v13 = vor.u32 1.1754944e-38, %v574_v7  ;;  %vm573_vm8 = vcmp.eq.f32.partialorder %v572_v9, 8.507059e+37 }
 0x10c   : > { %v551_v63 = vmul.f32 %v768_v59, %v550_v62 }
 0x10e   : > { %v552_v3 = vadd.f32 %v768_v59, %v551_v63 }
 0x10f   : > { %v770_v0 = vpop.eup %769 }
 0x110   : > { %v564_v1 = vmul.f32 %v770_v0, %v547_v60  ;;  %vm569_vm4 = vweird.f32 %v770_v0  ;;  %v556_v12 = vsel %vm1053_vm3, %v768_v59, %v552_v3 }
 0x111   : > { %vm570_vm7 = vmor %vm568_vm6, %vm569_vm4  ;;  %v561_v15 = vsel %vm558_vm5, %v560_v10, %v556_v12 }
 0x112   : > { %v565_v5 = vsub.f32 1.0, %v564_v1  ;;  %v578_v18 = vperm.slane %v561_v15, 0 }
 0x114   : > { %v566_v8 = vmul.f32 %v770_v0, %v565_v5 }
 0x116   : > { %v567_v11 = vadd.f32 %v770_v0, %v566_v8 }
 0x118   : > { %v571_v14 = vsel %vm570_vm7, %v770_v0, %v567_v11 }
 0x119   : > { %v576_v16 = vsel %vm573_vm8, %v575_v13, %v571_v14 }
 0x11a   : > { %v579_v17 = vperm.slane %v576_v16, 0 }
 0x11c   : > { %v582_v19 = vrot.slane %v579_v17, 4 }
 0x11e   : > { %v583_v20 = vsel %vm214_vm0, %v578_v18, %v582_v19 }
 0x11f   : > { %v585_v21 = vmul.f32 %v583_v20, %v1037_v58 }
 0x121   : > { %586 = vst [vmem:[%s206_s18] sm:$0xff] %v585_v21 }
 0x122   : > { %858 = shalt.err (!%p855_p9)
}
 0x123   : > { %710 = dma.vmem_to_hbm [thread:$0]  (%p989_p13), %s602_s19, 128, %s604_s22, %s588_s20  }
 0x124 PF: > { %s615_s6 = sand.u32 1, %s889_s14   ;;  %p1107_p10 = scmp.ge.s32.totalorder %s901_s17, 2 }
 0x125   : > { %s616_s9 = scalar_lea.sflag [#allocation5], %s615_s6 }
 0x126   : > { %p721_p11 = pnand %p1107_p10, %p994_p4 }
 0x128   : > { %p722_p0 = pneg %p721_p11 }
 0x12a   : > { %884 = dma.done.wait (%p722_p0), %s616_s9, 128  }
 0x12b   : > { %886 = vsyncadd (%p722_p0), %s616_s9, 4294967168  ;;  %p18_p2 = scmp.ge.s32.totalorder %s969_s27, 4   ;;  %s1108_s14 = smov %s893_s15 }
 0x12c   : > { %s1109_s15 = smov %s897_s16  ;;  %s1110_s16 = smov %s981_s30 }
 0x12d   : > { %s1111_s17 = smov %s969_s27  ;;  %20 = sbr.rel (!%p18_p2) target bundleno = 8 (0x8), region = 81 }
 0x132   :  { %622 = vsyncpa [#allocation4], 1 }
 0x133   :  { %624 = vsyncpa [#allocation4 + $0x1], 1 }
 0x134   :  { %625 = vsyncpa [#allocation7], 1 }
 0x135   :  { %626 = vsyncpa [#allocation5], 1 }
 0x136   :  { %628 = vsyncpa [#allocation5 + $0x1], 1 }

</bundles_post_ra>
